<compile_context>
chip_gen: v5e
topology: v5e:2x2
jax: 0.10.0
libtpu: 0.0.40
codegen_flags: <defaults>
</compile_context>

<pallas_src>
import itertools
from functools import partial

import numpy as np
import jax
import jax.numpy as jnp
from jax import lax
from jax.experimental import pallas as pl
from jax.experimental.pallas import tpu as pltpu


# ------------------------------------------------------------------ helpers
def _cdiv(a, b):
    return -(-a // b)


def _round_up(a, b):
    return _cdiv(a, b) * b


_VMEM_BUDGET = 28 * 1024 * 1024          # planned double-buffered footprint
_VMEM_LIMIT = 48 * 1024 * 1024           # < 64 MiB physical VMEM on v7x
_DTYPES = {"bfloat16": jnp.bfloat16, "float32": jnp.float32}


def _choose_tiles(M, K, N, out_bytes):
    """Few grid steps, tiles bounded by the VMEM budget (bf16 LHS/RHS)."""
    Mp = _round_up(max(M, 1), 16)        # 16: bf16 sublane packing granularity
    Kp = _round_up(max(K, 1), 128)
    Np = _round_up(max(N, 1), 128)
    tm = min(Mp, 2048)
    tk = min(Kp, 8192)
    tn = min(Np, 1024)

    def cost(a, b, c):
        # 2x buffered bf16 LHS/RHS + 2x out + f32 acc scratch + bias/scale/shift
        return (2 * a * b * 2 + 2 * b * c * 2 + 2 * a * c * out_bytes
                + a * c * 4 + 6 * c * 4)

    while cost(tm, tk, tn) > _VMEM_BUDGET and tk > 128:
        tk = max(128, _round_up(tk // 2, 128))
    while cost(tm, tk, tn) > _VMEM_BUDGET and tm > 16:
        tm = max(16, _round_up(tm // 2, 16))
    while cost(tm, tk, tn) > _VMEM_BUDGET and tn > 128:
        tn = max(128, _round_up(tn // 2, 128))
    # balance tile sizes over the number of tiles actually needed
    tm = _round_up(_cdiv(Mp, _cdiv(Mp, tm)), 16)
    tk = _round_up(_cdiv(Kp, _cdiv(Kp, tk)), 128)
    tn = _round_up(_cdiv(Np, _cdiv(Np, tn)), 128)
    return _round_up(Mp, tm), _round_up(Kp, tk), _round_up(Np, tn), tm, tk, tn


# ------------------------------------------------------------------ Pallas GEMM
def _matmul_kernel(x_ref, w_ref, b_ref, s_ref, t_ref, o_ref, acc_ref, *, act):
    @pl.when(pl.program_id(2) == 0)
    def _():
        acc_ref[...] = jnp.zeros_like(acc_ref)

    acc_ref[...] += jnp.dot(x_ref[...], w_ref[...],
                            preferred_element_type=jnp.float32)

    @pl.when(pl.program_id(2) == pl.num_programs(2) - 1)
    def _():
        r = acc_ref[...] + b_ref[...]
        if act == "relu":
            r = jnp.maximum(r, 0.0)
        elif act == "sigmoid":
            r = jax.nn.sigmoid(r)
        r = r * s_ref[...] + t_ref[...]          # fused eval-mode BatchNorm
        o_ref[...] = r.astype(o_ref.dtype)


@partial(jax.jit, static_argnames=("act", "out_dtype"))
def pallas_matmul(x, w, b, scale, shift, *, act=None, out_dtype="bfloat16"):
    """y = (act(x @ w + b)) * scale + shift.  x:(M,K), w:(K,N); bf16 MXU."""
    M, K = x.shape
    K2, N = w.shape
    assert K2 == K
    od = _DTYPES[out_dtype]
    Mp, Kp, Np, tm, tk, tn = _choose_tiles(M, K, N, np.dtype(od).itemsize)
    xp = jnp.pad(x.astype(jnp.bfloat16), ((0, Mp - M), (0, Kp - K)))
    wp = jnp.pad(w.astype(jnp.bfloat16), ((0, Kp - K), (0, Np - N)))
    bp = jnp.pad(b.astype(jnp.float32).reshape(1, N), ((0, 0), (0, Np - N)))
    sp = jnp.pad(scale.astype(jnp.float32).reshape(1, N), ((0, 0), (0, Np - N)))
    tp = jnp.pad(shift.astype(jnp.float32).reshape(1, N), ((0, 0), (0, Np - N)))
    out = pl.pallas_call(
        partial(_matmul_kernel, act=act),
        out_shape=jax.ShapeDtypeStruct((Mp, Np), od),
        grid_spec=pltpu.PrefetchScalarGridSpec(
            num_scalar_prefetch=0,
            grid=(Mp // tm, Np // tn, Kp // tk),
            in_specs=[
                pl.BlockSpec((tm, tk), lambda i, j, k: (i, k)),
                pl.BlockSpec((tk, tn), lambda i, j, k: (k, j)),
                pl.BlockSpec((1, tn), lambda i, j, k: (0, j)),
                pl.BlockSpec((1, tn), lambda i, j, k: (0, j)),
                pl.BlockSpec((1, tn), lambda i, j, k: (0, j)),
            ],
            out_specs=pl.BlockSpec((tm, tn), lambda i, j, k: (i, j)),
            scratch_shapes=[pltpu.VMEM((tm, tn), jnp.float32)],
        ),
        compiler_params=pltpu.CompilerParams(
            dimension_semantics=("parallel", "parallel", "arbitrary"),
            vmem_limit_bytes=_VMEM_LIMIT),
    )(xp, wp, bp, sp, tp)
    return out[:M, :N]


def linear(x, w, b, act, out_dtype):
    N = w.shape[1]
    return pallas_matmul(x, w, b, jnp.ones((N,), jnp.float32),
                         jnp.zeros((N,), jnp.float32), act=act,
                         out_dtype=out_dtype)


# ------------------------------------------------------------------ im2col glue
def _extract_patches(xp, starts, Qs, strides):
    """xp:(B,*Spad,C) -> (B*prod(Q), prod(ntaps)*C), column order (taps..., C)."""
    nsp = len(starts)
    a = xp
    for d in range(nsp):
        ax = 1 + d
        Q, st = Qs[d], strides[d]
        if st == 1:
            sl = [lax.dynamic_slice_in_dim(a, s0, Q, axis=ax) for s0 in starts[d]]
        else:
            sl = [lax.slice_in_dim(a, s0, s0 + st * (Q - 1) + 1, stride=st, axis=ax)
                  for s0 in starts[d]]
        a = jnp.stack(sl, axis=1 + nsp + d)
    M = xp.shape[0] * int(np.prod(Qs))
    K = int(np.prod([len(s) for s in starts])) * xp.shape[-1]
    return a.reshape(M, K)


def conv2d(x, L):
    """x: (B,H,W,Ci) channels-last; L: prepared layer (fused bias+act)."""
    B, H, W, _ = x.shape
    k, s, p = L["k"], L["s"], L["p"]
    xp = jnp.pad(x, ((0, 0), (p, p), (p, p), (0, 0)))
    Qh = (H + 2 * p - k) // s + 1
    Qw = (W + 2 * p - k) // s + 1
    patches = _extract_patches(xp, (tuple(range(k)), tuple(range(k))),
                               (Qh, Qw), (s, s))
    y = pallas_matmul(patches, L["wmat"], L["b"], L["scale"], L["shift"],
                      act=L["act"], out_dtype="bfloat16")
    return y.reshape(B, Qh, Qw, L["Co"])


# ------------------------------------------------------------------ deconv (phase decomposition)
def _axis_phase_info(I, k, s, p):
    """Per-axis phase decomposition of a 1-D transposed conv (PyTorch semantics)."""
    P = k - 1 - p
    O = (I - 1) * s - 2 * p + k
    phases = []
    for r in range(s):
        c = (P - r) % s
        n = len(range(c, k, s))
        base = (r + c - P) // s          # exact (r+c-P is divisible by s)
        Q = len(range(r, O, s))
        phases.append(dict(r=r, c=c, n=n, base=base, Q=Q))
    n_max = max(ph["n"] for ph in phases)
    Q_max = max(ph["Q"] for ph in phases)
    PL = max(0, max(-ph["base"] for ph in phases))
    PR = max(0, max(Q_max - 1 + n_max - 1 + ph["base"] - (I - 1) for ph in phases))
    return dict(O=O, phases=phases, n_max=n_max, Q_max=Q_max, PL=PL, PR=PR)


def _prep_deconv(w_pt, bias, scale, shift, k, s, pad, in_spatial, act, out_dtype):
    """Precompute per-phase matmul weights + patch offsets for a ConvTranspose3d."""
    Ci, Co = int(w_pt.shape[0]), int(w_pt.shape[1])
    # (Ci,Co,kd,kh,kw) -> flipped (kd,kh,kw,Ci,Co)
    wf = jnp.flip(jnp.transpose(w_pt, (2, 3, 4, 0, 1)), axis=(0, 1, 2)).astype(jnp.float32)
    infos = [_axis_phase_info(in_spatial[d], k[d], s[d], pad[d]) for d in range(3)]
    n_max = tuple(inf["n_max"] for inf in infos)
    phases = []
    for phd, phh, phw in itertools.product(infos[0]["phases"], infos[1]["phases"],
                                           infos[2]["phases"]):
        sub = wf[phd["c"]::s[0], phh["c"]::s[1], phw["c"]::s[2]]
        sub = jnp.pad(sub, ((0, n_max[0] - sub.shape[0]),
                            (0, n_max[1] - sub.shape[1]),
                            (0, n_max[2] - sub.shape[2]), (0, 0), (0, 0)))
        wmat = sub.reshape(n_max[0] * n_max[1] * n_max[2] * Ci, Co).astype(jnp.bfloat16)
        starts = tuple(tuple(m + ph["base"] + inf["PL"] for m in range(inf["n_max"]))
                       for ph, inf in ((phd, infos[0]), (phh, infos[1]), (phw, infos[2])))
        phases.append(dict(wmat=wmat, starts=starts, r=(phd["r"], phh["r"], phw["r"])))
    return dict(phases=phases, stride=tuple(s),
                pad_cfg=tuple((inf["PL"], inf["PR"]) for inf in infos),
                Q_max=tuple(inf["Q_max"] for inf in infos),
                out_spatial=tuple(inf["O"] for inf in infos),
                bias=bias.astype(jnp.float32), scale=scale.astype(jnp.float32),
                shift=shift.astype(jnp.float32), act=act, Co=Co, out_dtype=out_dtype)


def deconv3d(x, L):
    """x: (B,D,H,W,Ci) channels-last; fused bias + act + eval-BN epilogue."""
    B = x.shape[0]
    Co = L["Co"]
    sd, sh, sw = L["stride"]
    Od, Oh, Ow = L["out_spatial"]
    Qd, Qh, Qw = L["Q_max"]
    xp = jnp.pad(x, ((0, 0),) + L["pad_cfg"] + ((0, 0),))
    outs = []
    for ph in L["phases"]:
        patches = _extract_patches(xp, ph["starts"], L["Q_max"], (1, 1, 1))
        y = pallas_matmul(patches, ph["wmat"], L["bias"], L["scale"], L["shift"],
                          act=L["act"], out_dtype=L["out_dtype"])
        outs.append(y.reshape(B, Qd, Qh, Qw, Co))
    if len(outs) == 1:                      # stride 1: single phase
        return outs[0]
    y = jnp.stack(outs, axis=0).reshape(sd, sh, sw, B, Qd, Qh, Qw, Co)
    y = jnp.transpose(y, (3, 4, 0, 5, 1, 6, 2, 7)).reshape(B, Qd * sd, Qh * sh, Qw * sw, Co)
    return y[:, :Od, :Oh, :Ow, :]


# ------------------------------------------------------------------ cheap glue
def maxpool2d(x, k=3, s=2):
    return lax.reduce_window(x, jnp.array(-jnp.inf, x.dtype), lax.max,
                             (1, k, k, 1), (1, s, s, 1), "VALID")


def adaptive_avg_pool2d(x, out_hw):
    B, H, W, C = x.shape
    oh, ow = out_hw
    xf = x.astype(jnp.float32)
    rows = []
    for i in range(oh):
        hs, he = (i * H) // oh, -((-(i + 1) * H) // oh)
        cols = []
        for j in range(ow):
            ws, we = (j * W) // ow, -((-(j + 1) * W) // ow)
            cols.append(jnp.mean(xf[:, hs:he, ws:we, :], axis=(1, 2)))
        rows.append(jnp.stack(cols, axis=1))
    return jnp.stack(rows, axis=1).astype(x.dtype)


def interpolate_nearest(x, size):
    # F.interpolate(..., mode='nearest'):  src = floor(dst * in / out)
    for axis, osz in zip((1, 2, 3), size):
        isz = x.shape[axis]
        idx = (jnp.arange(osz) * isz) // osz
        x = jnp.take(x, idx, axis=axis)
    return x


# ------------------------------------------------------------------ model
def alexnet_embedding(radio, prep):
    x = jnp.transpose(radio, (0, 2, 3, 1)).astype(jnp.bfloat16)   # -> NHWC
    x = conv2d(x, prep["c1"]); x = maxpool2d(x)
    x = conv2d(x, prep["c2"]); x = maxpool2d(x)
    x = conv2d(x, prep["c3"])
    x = conv2d(x, prep["c4"])
    x = conv2d(x, prep["c5"]); x = maxpool2d(x)
    x = adaptive_avg_pool2d(x, (6, 6))
    B = x.shape[0]
    x = jnp.transpose(x, (0, 3, 1, 2)).reshape(B, -1)             # (C,H,W) flatten
    # Dropout layers are identity in eval mode.
    x = linear(x, prep["fc6_w"], prep["fc6_b"], "relu", "bfloat16")
    x = linear(x, prep["fc7_w"], prep["fc7_b"], "relu", "bfloat16")
    x = linear(x, prep["fc8_w"], prep["fc8_b"], None, "float32")   # -> 216
    return x


def tdecoder(pred, prep, input_size):
    B = pred.shape[0]
    x = linear(pred.astype(jnp.bfloat16), prep["fc_w"], prep["fc_b"], None, "bfloat16")
    x = x.reshape(B, 256, 3, 2, 4).transpose(0, 2, 3, 4, 1)        # -> NDHWC
    # Original order per layer: deconv -> ReLU -> interpolate -> BatchNorm.
    # BN is per-channel affine and nearest-interp is a channelwise gather, so BN
    # commutes with the interpolation and is folded into the deconv epilogue.
    x = deconv3d(x, prep["d1"]); x = interpolate_nearest(x, (7, 4, 9))
    x = deconv3d(x, prep["d2"]); x = interpolate_nearest(x, (15, 9, 19))
    x = deconv3d(x, prep["d3"]); x = interpolate_nearest(x, (30, 18, 39))
    x = deconv3d(x, prep["d4"]); x = interpolate_nearest(x, (60, 36, 79))
    x = deconv3d(x, prep["d5"]); x = interpolate_nearest(x, input_size)
    x = deconv3d(x, prep["d6"])                                    # sigmoid, f32
    # self.pool (AdaptiveAvgPool3d) is defined in TDecoder but unused in forward.
    return jnp.transpose(x, (0, 4, 1, 2, 3))                       # -> NCDHW


def radio_to_emb(radio, prep, input_size):
    pred = alexnet_embedding(radio, prep)
    outp = tdecoder(pred, prep, input_size)
    return pred, outp


# ------------------------------------------------------------------ parameters
def init_params(key):
    keys = iter(jax.random.split(key, 64))

    def u(shape, fan_in):
        bound = 1.0 / np.sqrt(fan_in)
        return jax.random.uniform(next(keys), shape, jnp.float32, -bound, bound)

    p = {}
    for name, co, ci, k in [("c1", 64, 1, 11), ("c2", 192, 64, 5),
                            ("c3", 384, 192, 3), ("c4", 256, 384, 3),
                            ("c5", 256, 256, 3)]:
        fan = ci * k * k
        p[name + "_w"] = u((co, ci, k, k), fan)
        p[name + "_b"] = u((co,), fan)
    p["fc6_w"], p["fc6_b"] = u((4096, 9216), 9216), u((4096,), 9216)
    p["fc7_w"], p["fc7_b"] = u((4096, 4096), 4096), u((4096,), 4096)
    p["fc8_w"], p["fc8_b"] = u((216, 4096), 4096), u((216,), 4096)
    p["fc_w"], p["fc_b"] = u((6144, 216), 216), u((6144,), 216)
    for name, ci, co, k in [("d1", 256, 384, 3), ("d2", 384, 256, 3),
                            ("d3", 256, 128, 5), ("d4", 128, 96, 5),
                            ("d5", 96, 48, 3), ("d6", 48, 1, 3)]:
        fan = ci * k * k * k
        p[name + "_w"] = u((ci, co, k, k, k), fan)   # PyTorch ConvTranspose layout
        p[name + "_b"] = u((co,), fan)
    for i, c in zip(range(1, 6), (384, 256, 128, 96, 48)):
        p[f"bn{i}_g"] = jnp.ones((c,), jnp.float32)
        p[f"bn{i}_b"] = jnp.zeros((c,), jnp.float32)
        p[f"bn{i}_m"] = jnp.zeros((c,), jnp.float32)
        p[f"bn{i}_v"] = jnp.ones((c,), jnp.float32)
    return p


def prepare_params(p, input_size):
    """One-time conversion of PyTorch-layout params to matmul-ready bf16 layouts."""
    prep = {}
    for name, (k, s, pad) in dict(c1=(11, 4, 2), c2=(5, 1, 2), c3=(3, 1, 1),
                                  c4=(3, 1, 1), c5=(3, 1, 1)).items():
        w = p[name + "_w"]
        Co = int(w.shape[0])
        prep[name] = dict(
            wmat=jnp.transpose(w, (2, 3, 1, 0)).reshape(-1, Co).astype(jnp.bfloat16),
            b=p[name + "_b"].astype(jnp.float32),
            scale=jnp.ones((Co,), jnp.float32), shift=jnp.zeros((Co,), jnp.float32),
            k=k, s=s, p=pad, Co=Co, act="relu")
    for name in ("fc6", "fc7", "fc8", "fc"):
        prep[name + "_w"] = jnp.transpose(p[name + "_w"]).astype(jnp.bfloat16)
        prep[name + "_b"] = p[name + "_b"].astype(jnp.float32)
    deconv_cfg = [
        ("d1", (3, 3, 3), (1, 1, 1), (1, 1, 1), (3, 2, 4), "bn1", "relu", "bfloat16"),
        ("d2", (3, 3, 3), (1, 1, 1), (1, 1, 1), (7, 4, 9), "bn2", "relu", "bfloat16"),
        ("d3", (5, 5, 5), (1, 1, 1), (2, 2, 2), (15, 9, 19), "bn3", "relu", "bfloat16"),
        ("d4", (5, 5, 5), (2, 2, 3), (2, 2, 2), (30, 18, 39), "bn4", "relu", "bfloat16"),
        ("d5", (3, 3, 3), (1, 1, 1), (1, 1, 1), (60, 36, 79), "bn5", "relu", "bfloat16"),
        ("d6", (3, 3, 3), (1, 1, 1), (1, 1, 1), tuple(input_size), None, "sigmoid", "float32"),
    ]
    for name, k, s, pad, in_sp, bn, act, odt in deconv_cfg:
        w = p[name + "_w"]
        Co = int(w.shape[1])
        if bn is not None:
            scale = p[bn + "_g"] / jnp.sqrt(p[bn + "_v"] + 1e-5)
            shift = p[bn + "_b"] - p[bn + "_m"] * scale
        else:
            scale = jnp.ones((Co,), jnp.float32)
            shift = jnp.zeros((Co,), jnp.float32)
        prep[name] = _prep_deconv(w, p[name + "_b"], scale, shift, k, s, pad,
                                  in_sp, act, odt)
    return prep


# ------------------------------------------------------------------ self-tests (tiny)
def _ref_deconv3d(x, w, b, s, p):  # numpy ref, NCDHW / (Ci,Co,kd,kh,kw)
    x = np.asarray(x, np.float64)
    w = np.asarray(w, np.float64)
    B, Ci, D, H, W = x.shape
    _, Co, kd, kh, kw = w.shape
    full = np.zeros((B, Co, (D - 1) * s[0] + kd, (H - 1) * s[1] + kh,
                     (W - 1) * s[2] + kw), np.float64)
    for zd in range(kd):
        for zh in range(kh):
            for zw in range(kw):
                c = np.einsum("bidhw,io->bodhw", x, w[:, :, zd, zh, zw])
                full[:, :, zd:zd + (D - 1) * s[0] + 1:s[0],
                           zh:zh + (H - 1) * s[1] + 1:s[1],
                           zw:zw + (W - 1) * s[2] + 1:s[2]] += c
    Od = (D - 1) * s[0] - 2 * p[0] + kd
    Oh = (H - 1) * s[1] - 2 * p[1] + kh
    Ow = (W - 1) * s[2] - 2 * p[2] + kw
    out = full[:, :, p[0]:p[0] + Od, p[1]:p[1] + Oh, p[2]:p[2] + Ow]
    return out + np.asarray(b, np.float64).reshape(1, Co, 1, 1, 1)


def _ref_conv2d(x, w, b, s, p):    # numpy ref, NCHW / OIHW
    x = np.asarray(x, np.float64)
    w = np.asarray(w, np.float64)
    B, Ci, H, W = x.shape
    Co, _, kh, kw = w.shape
    Ho = (H + 2 * p - kh) // s + 1
    Wo = (W + 2 * p - kw) // s + 1
    xp = np.pad(x, ((0, 0), (0, 0), (p, p), (p, p)))
    out = np.zeros((B, Co, Ho, Wo), np.float64)
    for i in range(kh):
        for j in range(kw):
            patch = xp[:, :, i:i + s * (Ho - 1) + 1:s, j:j + s * (Wo - 1) + 1:s]
            out += np.einsum("bchw,oc->bohw", patch, w[:, :, i, j])
    return out + np.asarray(b, np.float64).reshape(1, Co, 1, 1)


def _self_test():
    key = jax.random.PRNGKey(42)
    k1, k2, k3 = jax.random.split(key, 3)
    # strided ConvTranspose3d (same stride pattern as decoder conv4)
    Ci, Co, dims = 4, 3, (5, 4, 6)
    k, s, p = (5, 5, 5), (2, 2, 3), (2, 2, 2)
    x = jax.random.normal(k1, (1, Ci) + dims, jnp.float32) * 0.5
    w = jax.random.normal(k2, (Ci, Co) + k, jnp.float32) * 0.2
    b = jax.random.normal(k3, (Co,), jnp.float32) * 0.1
    L = _prep_deconv(w, b, jnp.ones((Co,), jnp.float32), jnp.zeros((Co,), jnp.float32),
                     k, s, p, dims, None, "float32")
    y = deconv3d(jnp.transpose(x, (0, 2, 3, 4, 1)).astype(jnp.bfloat16), L)
    y = np.asarray(jnp.transpose(y, (0, 4, 1, 2, 3)))
    np.testing.assert_allclose(y, _ref_deconv3d(x, w, b, s, p), atol=0.08, rtol=0.08)
    # stride-1 ConvTranspose3d
    Ci, Co, dims = 5, 3, (3, 4, 6)
    k, s, p = (3, 3, 3), (1, 1, 1), (1, 1, 1)
    x = jax.random.normal(k1, (1, Ci) + dims, jnp.float32) * 0.5
    w = jax.random.normal(k2, (Ci, Co) + k, jnp.float32) * 0.2
    L = _prep_deconv(w, b, jnp.ones((Co,), jnp.float32), jnp.zeros((Co,), jnp.float32),
                     k, s, p, dims, None, "float32")
    y = deconv3d(jnp.transpose(x, (0, 2, 3, 4, 1)).astype(jnp.bfloat16), L)
    y = np.asarray(jnp.transpose(y, (0, 4, 1, 2, 3)))
    np.testing.assert_allclose(y, _ref_deconv3d(x, w, b, s, p), atol=0.08, rtol=0.08)
    # strided Conv2d
    Ci, Co, kk, ss, pp = 3, 6, 5, 3, 2
    xc = jax.random.normal(k1, (1, Ci, 14, 14), jnp.float32) * 0.5
    wc = jax.random.normal(k2, (Co, Ci, kk, kk), jnp.float32) * 0.2
    bc = jax.random.normal(k3, (Co,), jnp.float32) * 0.1
    Lc = dict(wmat=jnp.transpose(wc, (2, 3, 1, 0)).reshape(-1, Co).astype(jnp.bfloat16),
              b=bc, scale=jnp.ones((Co,), jnp.float32), shift=jnp.zeros((Co,), jnp.float32),
              k=kk, s=ss, p=pp, Co=Co, act=None)
    yc = conv2d(jnp.transpose(xc, (0, 2, 3, 1)).astype(jnp.bfloat16), Lc)
    yc = np.asarray(jnp.transpose(yc, (0, 3, 1, 2)).astype(jnp.float32))
    np.testing.assert_allclose(yc, _ref_conv2d(xc, wc, bc, ss, pp), atol=0.08, rtol=0.08)


# ------------------------------------------------------------------ main
if __name__ == "__main__":
    _self_test()

    # Small but module-consistent shapes: batch=1, 1x64x64 radio image (AlexNet
    # arithmetic works for >=63px), small decoder output size.  Decoder interior
    # sizes are fixed by the hard-coded F.interpolate targets in the module.
    input_size = (8, 6, 10)
    key_p, key_x = jax.random.split(jax.random.PRNGKey(0))
    params = init_params(key_p)
    prep = prepare_params(params, input_size)
    radio = jax.random.normal(key_x, (1, 1, 64, 64), jnp.float32)

    pred, outp = radio_to_emb(radio, prep, input_size)
    pred, outp = jax.block_until_ready((pred, outp))

    assert pred.shape == (1, 216), pred.shape
    assert outp.shape == (1, 1) + input_size, outp.shape
    assert bool(jnp.isfinite(pred).all()) and bool(jnp.isfinite(outp).all())
    print("KERNEL_OK")
</pallas_src>

<mosaic_0001>
module attributes {stable_mosaic.version = 11 : i64} {
  func.func @_matmul_kernel(%arg0: i32, %arg1: i32, %arg2: i32, %arg3: memref<128x128xbf16, #tpu.memory_space<vmem>>, %arg4: memref<128x128xbf16, #tpu.memory_space<vmem>>, %arg5: memref<1x128xf32, #tpu.memory_space<vmem>>, %arg6: memref<1x128xf32, #tpu.memory_space<vmem>>, %arg7: memref<1x128xf32, #tpu.memory_space<vmem>>, %arg8: memref<128x128xf32, #tpu.memory_space<vmem>>, %arg9: memref<128x128xf32, #tpu.memory_space<vmem>>) attributes {dimension_semantics = [#tpu.dimension_semantics<parallel>, #tpu.dimension_semantics<parallel>, #tpu.dimension_semantics<arbitrary>], iteration_bounds = array<i64: 1, 1, 1>, scalar_prefetch = 0 : i64, scratch_operands = 1 : i64, tpu.core_type = #tpu.core_type<tc>, window_params = [{transform_indices = @transform_0, window_bounds = array<i64: 128, 128>}, {transform_indices = @transform_1, window_bounds = array<i64: 128, 128>}, {transform_indices = @transform_2, window_bounds = array<i64: 1, 128>}, {transform_indices = @transform_3, window_bounds = array<i64: 1, 128>}, {transform_indices = @transform_4, window_bounds = array<i64: 1, 128>}, {transform_indices = @transform_5, window_bounds = array<i64: 128, 128>}]} {
    %c0_i32 = arith.constant 0 : i32
    %0 = arith.cmpi eq, %arg2, %c0_i32 : i32
    %1 = arith.extui %0 : i1 to i32
    %c0_i32_0 = arith.constant 0 : i32
    %2 = arith.cmpi ne, %1, %c0_i32_0 : i32
    scf.if %2 {
      %cst_10 = arith.constant 0.000000e+00 : f32
      %12 = vector.broadcast %cst_10 : f32 to vector<128x128xf32>
      %c0_11 = arith.constant 0 : index
      %c0_12 = arith.constant 0 : index
      %13 = vector.load %arg9[%c0_11, %c0_12] : memref<128x128xf32, #tpu.memory_space<vmem>>, vector<128x128xf32>
      tpu.vector_store %arg9[%c0_11, %c0_12], %12 {strides = array<i32>} : memref<128x128xf32, #tpu.memory_space<vmem>>, vector<128x128xf32>,
    } else {
    }
    %c0 = arith.constant 0 : index
    %c0_1 = arith.constant 0 : index
    %3 = vector.load %arg9[%c0, %c0_1] : memref<128x128xf32, #tpu.memory_space<vmem>>, vector<128x128xf32>
    %c0_2 = arith.constant 0 : index
    %c0_3 = arith.constant 0 : index
    %4 = vector.load %arg3[%c0_2, %c0_3] : memref<128x128xbf16, #tpu.memory_space<vmem>>, vector<128x128xbf16>
    %c0_4 = arith.constant 0 : index
    %c0_5 = arith.constant 0 : index
    %5 = vector.load %arg4[%c0_4, %c0_5] : memref<128x128xbf16, #tpu.memory_space<vmem>>, vector<128x128xbf16>
    %cst = arith.constant dense<0.000000e+00> : vector<128x128xf32>
    %6 = tpu.matmul %4, %5, %cst {dimension_numbers = #tpu.dot_dimension_numbers<[1], [0], [0], [1], [0, 0, 1, 1], [], []>} : vector<128x128xbf16>, vector<128x128xbf16>, vector<128x128xf32> -> vector<128x128xf32>
    %7 = arith.addf %3, %6 : vector<128x128xf32>
    %c0_6 = arith.constant 0 : index
    %c0_7 = arith.constant 0 : index
    %8 = vector.load %arg9[%c0_6, %c0_7] : memref<128x128xf32, #tpu.memory_space<vmem>>, vector<128x128xf32>
    tpu.vector_store %arg9[%c0_6, %c0_7], %7 {strides = array<i32>} : memref<128x128xf32, #tpu.memory_space<vmem>>, vector<128x128xf32>,
    %c0_i32_8 = arith.constant 0 : i32
    %9 = arith.cmpi eq, %arg2, %c0_i32_8 : i32
    %10 = arith.extui %9 : i1 to i32
    %c0_i32_9 = arith.constant 0 : i32
    %11 = arith.cmpi ne, %10, %c0_i32_9 : i32
    scf.if %11 {
      %c0_10 = arith.constant 0 : index
      %c0_11 = arith.constant 0 : index
      %12 = vector.load %arg9[%c0_10, %c0_11] : memref<128x128xf32, #tpu.memory_space<vmem>>, vector<128x128xf32>
      %c0_12 = arith.constant 0 : index
      %c0_13 = arith.constant 0 : index
      %13 = vector.load %arg5[%c0_12, %c0_13] : memref<1x128xf32, #tpu.memory_space<vmem>>, vector<1x128xf32>
      %14 = vector.broadcast %13 : vector<1x128xf32> to vector<128x128xf32>
      %15 = arith.addf %12, %14 : vector<128x128xf32>
      %c0_14 = arith.constant 0 : index
      %c0_15 = arith.constant 0 : index
      %16 = vector.load %arg6[%c0_14, %c0_15] : memref<1x128xf32, #tpu.memory_space<vmem>>, vector<1x128xf32>
      %17 = vector.broadcast %16 : vector<1x128xf32> to vector<128x128xf32>
      %18 = arith.mulf %15, %17 : vector<128x128xf32>
      %c0_16 = arith.constant 0 : index
      %c0_17 = arith.constant 0 : index
      %19 = vector.load %arg7[%c0_16, %c0_17] : memref<1x128xf32, #tpu.memory_space<vmem>>, vector<1x128xf32>
      %20 = vector.broadcast %19 : vector<1x128xf32> to vector<128x128xf32>
      %21 = arith.addf %18, %20 : vector<128x128xf32>
      %c0_18 = arith.constant 0 : index
      %c0_19 = arith.constant 0 : index
      %22 = vector.load %arg8[%c0_18, %c0_19] : memref<128x128xf32, #tpu.memory_space<vmem>>, vector<128x128xf32>
      tpu.vector_store %arg8[%c0_18, %c0_19], %21 {strides = array<i32>} : memref<128x128xf32, #tpu.memory_space<vmem>>, vector<128x128xf32>,
    } else {
    }
    return
  }
  func.func @transform_0(%arg0: i32, %arg1: i32, %arg2: i32) -> (i32, i32) {
    %c0_i32 = arith.constant 0 : i32
    return %arg0, %arg2 : i32, i32
  }
  func.func @transform_1(%arg0: i32, %arg1: i32, %arg2: i32) -> (i32, i32) {
    %c0_i32 = arith.constant 0 : i32
    return %arg2, %arg1 : i32, i32
  }
  func.func @transform_2(%arg0: i32, %arg1: i32, %arg2: i32) -> (i32, i32) {
    %c0_i32 = arith.constant 0 : i32
    %c0_i32_0 = arith.constant 0 : i32
    return %c0_i32, %arg1 : i32, i32
  }
  func.func @transform_3(%arg0: i32, %arg1: i32, %arg2: i32) -> (i32, i32) {
    %c0_i32 = arith.constant 0 : i32
    %c0_i32_0 = arith.constant 0 : i32
    return %c0_i32, %arg1 : i32, i32
  }
  func.func @transform_4(%arg0: i32, %arg1: i32, %arg2: i32) -> (i32, i32) {
    %c0_i32 = arith.constant 0 : i32
    %c0_i32_0 = arith.constant 0 : i32
    return %c0_i32, %arg1 : i32, i32
  }
  func.func @transform_5(%arg0: i32, %arg1: i32, %arg2: i32) -> (i32, i32) {
    %c0_i32 = arith.constant 0 : i32
    return %arg0, %arg1 : i32, i32
  }
}

</mosaic_0001>

<bundles_post_ra>
// kernel: pallas_matmul.1
= control target key start
LH: loop header
LB: loop body
LE: loop exit
PB: predicated region body
PF: predicated region fallthrough
CT: control target
= control target key end

     0   :  { %s660_s1 = inlined_call_operand.vmem [shape: bf16[128,128], index: 1, kind: input, shape index: {}]   ;;  %s661_s2 = inlined_call_operand.vmem [shape: f32[1,128], index: 2, kind: input, shape index: {}]   ;;  %s662_s3 = inlined_call_operand.vmem [shape: f32[1,128], index: 3, kind: input, shape index: {}]   ;;  %s663_s4 = inlined_call_operand.vmem [shape: f32[1,128], index: 4, kind: input, shape index: {}]   ;;  %s664_s0 = inlined_call_operand.vmem [shape: bf16[128,128], index: 0, kind: input, shape index: {}]   ;;  %s665_s5 = inlined_call_operand.vmem [shape: f32[128,128], index: 5, kind: output, shape index: {}]  }
   0x1   :  { %v443_v0 = vld [vmem:[%s660_s1 + $0x38] sm:$0xff]  ;;  %v442_v1 = vld [vmem:[%s660_s1 + $0x30] sm:$0xff]  ;;  %v441_v2 = vld [vmem:[%s660_s1 + $0x28] sm:$0xff] }
   0x2   :  { %184 = vmatpush.bf16.msra.mxu0 %v443_v0  ;;  %444 = vmatpush.bf16.msra.mxu1 %v443_v0  ;;  %v440_v3 = vld [vmem:[%s660_s1 + $0x20] sm:$0xff]  ;;  %v439_v4 = vld [vmem:[%s660_s1 + $0x18] sm:$0xff]  ;;  %v438_v5 = vld [vmem:[%s660_s1 + $0x10] sm:$0xff] }
   0x3   :  { %445 = vmatpush.bf16.msra.mxu2 %v443_v0  ;;  %446 = vmatpush.bf16.msra.mxu3 %v443_v0  ;;  %v437_v6 = vld [vmem:[%s660_s1 + $0x8] sm:$0xff]  ;;  %v436_v7 = vld [vmem:[%s660_s1] sm:$0xff]  ;;  %v430_v9 = vld [vmem:[%s664_s0 + $0x10] sm:$0xff] }
   0x4   :  { %v428_v8 = vld [vmem:[%s664_s0] sm:$0xff]  ;;  %v434_v11 = vld [vmem:[%s664_s0 + $0x30] sm:$0xff]  ;;  %v429_v12 = vld [vmem:[%s664_s0 + $0x8] sm:$0xff] }
   0x5   :  { %v432_v10 = vld [vmem:[%s664_s0 + $0x20] sm:$0xff]  ;;  %v431_v13 = vld [vmem:[%s664_s0 + $0x18] sm:$0xff]  ;;  %v433_v14 = vld [vmem:[%s664_s0 + $0x28] sm:$0xff] }
   0x6   :  { %185 = vmatpush.bf16.msra.mxu0 %v442_v1  ;;  %447 = vmatpush.bf16.msra.mxu1 %v442_v1  ;;  %v435_v15 = vld [vmem:[%s664_s0 + $0x38] sm:$0xff]  ;;  %v552_v16 = vld [vmem:[%s661_s2] ss:$0 sm:$0xff] }
   0x7   :  { %448 = vmatpush.bf16.msra.mxu2 %v442_v1  ;;  %449 = vmatpush.bf16.msra.mxu3 %v442_v1  ;;  %v557_v17 = vld [vmem:[%s662_s3] ss:$0 sm:$0xff] }
   0x8   :  { %v563_v21 = vld [vmem:[%s663_s4] ss:$0 sm:$0xff] }
   0xa   :  { %186 = vmatpush.bf16.msra.mxu0 %v441_v2  ;;  %450 = vmatpush.bf16.msra.mxu1 %v441_v2 }
   0xb   :  { %451 = vmatpush.bf16.msra.mxu2 %v441_v2  ;;  %452 = vmatpush.bf16.msra.mxu3 %v441_v2 }
   0xe   :  { %187 = vmatpush.bf16.msra.mxu0 %v440_v3  ;;  %453 = vmatpush.bf16.msra.mxu1 %v440_v3 }
   0xf   :  { %454 = vmatpush.bf16.msra.mxu2 %v440_v3  ;;  %455 = vmatpush.bf16.msra.mxu3 %v440_v3 }
  0x12   :  { %188 = vmatpush.bf16.msra.mxu0 %v439_v4  ;;  %456 = vmatpush.bf16.msra.mxu1 %v439_v4 }
  0x13   :  { %457 = vmatpush.bf16.msra.mxu2 %v439_v4  ;;  %458 = vmatpush.bf16.msra.mxu3 %v439_v4 }
  0x16   :  { %189 = vmatpush.bf16.msra.mxu0 %v438_v5  ;;  %459 = vmatpush.bf16.msra.mxu1 %v438_v5 }
  0x17   :  { %460 = vmatpush.bf16.msra.mxu2 %v438_v5  ;;  %461 = vmatpush.bf16.msra.mxu3 %v438_v5 }
  0x1a   :  { %190 = vmatpush.bf16.msra.mxu0 %v437_v6  ;;  %462 = vmatpush.bf16.msra.mxu1 %v437_v6 }
  0x1b   :  { %463 = vmatpush.bf16.msra.mxu2 %v437_v6  ;;  %464 = vmatpush.bf16.msra.mxu3 %v437_v6 }
  0x1e   :  { %191 = vmatpush.bf16.msra.mxu0 %v436_v7  ;;  %465 = vmatpush.bf16.msra.mxu1 %v436_v7 }
  0x1f   :  { %466 = vmatpush.bf16.msra.mxu2 %v436_v7  ;;  %467 = vmatpush.bf16.msra.mxu3 %v436_v7 }
  0x21   :  { %192 = vmatmul.bf16.vlgmr.msra.gmra.mxu0 %v428_v8  ;;  %202 = vmatmul.bf16.vlgmr.msra.gmra.mxu1 %v430_v9 }
  0x22   :  { %212 = vmatmul.bf16.vlgmr.msra.gmra.mxu2 %v432_v10  ;;  %222 = vmatmul.bf16.vlgmr.msra.gmra.mxu3 %v434_v11 }
  0x31   :  { %197 = vmatmul.bf16.gmra.mxu0 %v429_v12  ;;  %207 = vmatmul.bf16.gmra.mxu1 %v431_v13 }
  0x32   :  { %217 = vmatmul.bf16.gmra.mxu2 %v433_v14  ;;  %227 = vmatmul.bf16.gmra.mxu3 %v435_v15 }
  0x9e   :  { %v193_v18 = vpop.f32.mrf.mxu0  ;;  %v203_v19 = vpop.f32.mrf.mxu1 }
  0x9f   :  { %v288_v20 = vadd.f32 %v552_v16, %v193_v18  ;;  %v292_v22 = vadd.f32 %v552_v16, %v203_v19 }
  0xa1   :  { %v308_v23 = vmul.f32 %v557_v17, %v288_v20  ;;  %v312_v24 = vmul.f32 %v557_v17, %v292_v22 }
  0xa3   :  { %v328_v25 = vadd.f32 %v563_v21, %v308_v23  ;;  %v332_v26 = vadd.f32 %v563_v21, %v312_v24 }
  0xa5   :  { %344 = vst [vmem:[%s665_s5] sm:$0xff] %v328_v25  ;;  %v213_v27 = vpop.f32.mrf.mxu2  ;;  %v223_v28 = vpop.f32.mrf.mxu3 }
  0xa6   :  { %348 = vst [vmem:[%s665_s5 + $0x20] sm:$0xff] %v332_v26  ;;  %v296_v29 = vadd.f32 %v552_v16, %v213_v27  ;;  %v300_v30 = vadd.f32 %v552_v16, %v223_v28  ;;  %v195_v31 = vpop.f32.mrf.mxu0  ;;  %v205_v32 = vpop.f32.mrf.mxu1 }
  0xa7   :  { %v289_v33 = vadd.f32 %v552_v16, %v195_v31  ;;  %v293_v34 = vadd.f32 %v552_v16, %v205_v32 }
  0xa8   :  { %v316_v35 = vmul.f32 %v557_v17, %v296_v29  ;;  %v320_v36 = vmul.f32 %v557_v17, %v300_v30 }
  0xa9   :  { %v309_v37 = vmul.f32 %v557_v17, %v289_v33  ;;  %v313_v38 = vmul.f32 %v557_v17, %v293_v34 }
  0xaa   :  { %v336_v39 = vadd.f32 %v563_v21, %v316_v35  ;;  %v340_v40 = vadd.f32 %v563_v21, %v320_v36 }
  0xab   :  { %v329_v41 = vadd.f32 %v563_v21, %v309_v37  ;;  %v333_v42 = vadd.f32 %v563_v21, %v313_v38 }
  0xac   :  { %352 = vst [vmem:[%s665_s5 + $0x40] sm:$0xff] %v336_v39 }
  0xad   :  { %356 = vst [vmem:[%s665_s5 + $0x60] sm:$0xff] %v340_v40  ;;  %v215_v43 = vpop.f32.mrf.mxu2  ;;  %v225_v44 = vpop.f32.mrf.mxu3 }
  0xae   :  { %345 = vst [vmem:[%s665_s5 + $0x8] sm:$0xff] %v329_v41  ;;  %v297_v45 = vadd.f32 %v552_v16, %v215_v43  ;;  %v301_v46 = vadd.f32 %v552_v16, %v225_v44  ;;  %v198_v47 = vpop.f32.mrf.mxu0  ;;  %v208_v48 = vpop.f32.mrf.mxu1 }
  0xaf   :  { %349 = vst [vmem:[%s665_s5 + $0x28] sm:$0xff] %v333_v42  ;;  %v290_v49 = vadd.f32 %v552_v16, %v198_v47  ;;  %v294_v50 = vadd.f32 %v552_v16, %v208_v48 }
  0xb0   :  { %v317_v51 = vmul.f32 %v557_v17, %v297_v45  ;;  %v321_v52 = vmul.f32 %v557_v17, %v301_v46 }
  0xb1   :  { %v310_v53 = vmul.f32 %v557_v17, %v290_v49  ;;  %v314_v54 = vmul.f32 %v557_v17, %v294_v50 }
  0xb2   :  { %v337_v55 = vadd.f32 %v563_v21, %v317_v51  ;;  %v341_v56 = vadd.f32 %v563_v21, %v321_v52 }
  0xb3   :  { %v330_v57 = vadd.f32 %v563_v21, %v310_v53  ;;  %v334_v58 = vadd.f32 %v563_v21, %v314_v54 }
  0xb4   :  { %353 = vst [vmem:[%s665_s5 + $0x48] sm:$0xff] %v337_v55 }
  0xb5   :  { %357 = vst [vmem:[%s665_s5 + $0x68] sm:$0xff] %v341_v56  ;;  %v218_v59 = vpop.f32.mrf.mxu2  ;;  %v228_v60 = vpop.f32.mrf.mxu3 }
  0xb6   :  { %346 = vst [vmem:[%s665_s5 + $0x10] sm:$0xff] %v330_v57  ;;  %v298_v61 = vadd.f32 %v552_v16, %v218_v59  ;;  %v302_v62 = vadd.f32 %v552_v16, %v228_v60  ;;  %v200_v63 = vpop.f32.mrf.mxu0  ;;  %v210_v0 = vpop.f32.mrf.mxu1 }
  0xb7   :  { %350 = vst [vmem:[%s665_s5 + $0x30] sm:$0xff] %v334_v58  ;;  %v291_v1 = vadd.f32 %v552_v16, %v200_v63  ;;  %v295_v2 = vadd.f32 %v552_v16, %v210_v0 }
  0xb8   :  { %v318_v3 = vmul.f32 %v557_v17, %v298_v61  ;;  %v322_v4 = vmul.f32 %v557_v17, %v302_v62 }
  0xb9   :  { %v311_v5 = vmul.f32 %v557_v17, %v291_v1  ;;  %v315_v6 = vmul.f32 %v557_v17, %v295_v2 }
  0xba   :  { %v338_v7 = vadd.f32 %v563_v21, %v318_v3  ;;  %v342_v8 = vadd.f32 %v563_v21, %v322_v4 }
  0xbb   :  { %v331_v9 = vadd.f32 %v563_v21, %v311_v5  ;;  %v335_v10 = vadd.f32 %v563_v21, %v315_v6 }
  0xbc   :  { %354 = vst [vmem:[%s665_s5 + $0x50] sm:$0xff] %v338_v7 }
  0xbd   :  { %358 = vst [vmem:[%s665_s5 + $0x70] sm:$0xff] %v342_v8  ;;  %v220_v11 = vpop.f32.mrf.mxu2  ;;  %v230_v12 = vpop.f32.mrf.mxu3 }
  0xbe   :  { %347 = vst [vmem:[%s665_s5 + $0x18] sm:$0xff] %v331_v9  ;;  %v299_v13 = vadd.f32 %v552_v16, %v220_v11  ;;  %v303_v14 = vadd.f32 %v552_v16, %v230_v12 }
  0xbf   :  { %351 = vst [vmem:[%s665_s5 + $0x38] sm:$0xff] %v335_v10 }
  0xc0   :  { %v319_v15 = vmul.f32 %v557_v17, %v299_v13  ;;  %v323_v18 = vmul.f32 %v557_v17, %v303_v14 }
  0xc2   :  { %v339_v19 = vadd.f32 %v563_v21, %v319_v15  ;;  %v343_v20 = vadd.f32 %v563_v21, %v323_v18 }
  0xc4   :  { %355 = vst [vmem:[%s665_s5 + $0x58] sm:$0xff] %v339_v19 }
  0xc5   :  { %359 = vst [vmem:[%s665_s5 + $0x78] sm:$0xff] %v343_v20 }

</bundles_post_ra>
